<compile_context>
chip_gen: v7x
topology: tpu7x:2x2x1
jax: 0.10.0
libtpu: 0.0.40
codegen_flags: <defaults>
</compile_context>

<pallas_src>
import functools

import jax
import jax.numpy as jnp
from jax.experimental import pallas as pl
from jax.experimental.pallas import tpu as pltpu


def _round_up(v, m):
    return (v + m - 1) // m * m


def _pick_tile_hw(hw, c, elem_bytes, target_bytes):
    """Lane-axis (H*W) tile: full extent if it fits the byte budget, otherwise
    the largest multiple of 128 lanes that does (>= 128)."""
    if hw <= 128 or hw * c * elem_bytes <= target_bytes:
        return hw
    t = (target_bytes // (c * elem_bytes)) // 128 * 128
    return int(max(t, 128))


# ---------------------------------------------------------------------------
# Fused single-pass kernel: pool + MLP + sigmoid + multiply, one batch element
# per grid step (whole (C, H*W) slab resident in VMEM).
# ---------------------------------------------------------------------------
def _fused_kernel(x_ref, w1_ref, w2_ref, o_ref, *, hw):
    x = x_ref[0].astype(jnp.float32)                            # (C, HW)
    avg = jnp.sum(x, axis=-1, keepdims=True) * (1.0 / hw)       # (C, 1)
    mx = jnp.max(x, axis=-1, keepdims=True)                     # (C, 1)

    def mlp(v):  # fc2(relu(fc1(v))) on a (C, 1) column; torch weight layout
        h = jnp.maximum(
            jnp.dot(w1_ref[...], v, preferred_element_type=jnp.float32), 0.0)
        return jnp.dot(w2_ref[...], h, preferred_element_type=jnp.float32)

    gate = jax.nn.sigmoid(mlp(avg) + mlp(mx))                   # (C, 1)
    o_ref[0] = (x * gate).astype(o_ref.dtype)                   # lane broadcast


# ---------------------------------------------------------------------------
# Two-pass path, pass 1: tiled pooling reduction + MLP + sigmoid -> gate
# ---------------------------------------------------------------------------
def _pool_gate_kernel(x_ref, w1_ref, w2_ref, gate_ref, sum_sc, max_sc,
                      *, hw, tile_hw, need_mask):
    t = pl.program_id(1)

    @pl.when(t == 0)
    def _init():
        sum_sc[...] = jnp.zeros_like(sum_sc)
        max_sc[...] = jnp.full_like(max_sc, -jnp.inf)

    x = x_ref[0].astype(jnp.float32)                            # (C, tile_hw)
    if need_mask:  # static: only traced when hw % tile_hw != 0
        col = jax.lax.broadcasted_iota(jnp.int32, x.shape, 1)
        valid = (t * tile_hw + col) < hw
        x_sum = jnp.where(valid, x, 0.0)
        x_max = jnp.where(valid, x, -jnp.inf)
    else:
        x_sum = x
        x_max = x
    sum_sc[...] += jnp.sum(x_sum, axis=-1, keepdims=True)               # (C, 1)
    max_sc[...] = jnp.maximum(max_sc[...],
                              jnp.max(x_max, axis=-1, keepdims=True))   # (C, 1)

    @pl.when(t == pl.num_programs(1) - 1)
    def _finalize():
        avg = sum_sc[...] * (1.0 / hw)                          # (C, 1)
        mx = max_sc[...]                                        # (C, 1)

        def mlp(v):
            h = jnp.maximum(
                jnp.dot(w1_ref[...], v, preferred_element_type=jnp.float32), 0.0)
            return jnp.dot(w2_ref[...], h, preferred_element_type=jnp.float32)

        gate_ref[0] = jax.nn.sigmoid(mlp(avg) + mlp(mx))        # (C, 1)


# ---------------------------------------------------------------------------
# Two-pass path, pass 2: y = x * gate (gate broadcast along the lane axis)
# ---------------------------------------------------------------------------
def _apply_gate_kernel(x_ref, g_ref, o_ref):
    o_ref[...] = (x_ref[...].astype(jnp.float32) * g_ref[...]).astype(o_ref.dtype)


# ---------------------------------------------------------------------------
# Public wrapper
# ---------------------------------------------------------------------------
def cbam_channel_forward(x_nchw, w1, w2, *,
                         fused_slab_bytes=2 << 20,   # per-batch slab threshold
                         block_bytes_p1=4 << 20,     # pass-1 input block budget
                         block_bytes_p2=2 << 20):    # pass-2 input block budget
    """CBAM channel attention.

    x_nchw: (N, C, H, W).
    w1: fc1.weight, shape (C//r, C).   w2: fc2.weight, shape (C, C//r).
    Both Linears are bias-free (as in the PyTorch module).
    """
    n, c, h, w = x_nchw.shape
    hw = h * w
    hid = w1.shape[0]
    itemsize = jnp.dtype(x_nchw.dtype).itemsize
    out_dtype = x_nchw.dtype

    x3d = x_nchw.reshape(n, c, hw)                  # zero-copy reshape, no transpose
    slab_bytes = c * hw * itemsize

    # padded-buffer helpers for explicit VMEM budgeting
    w_pad = (_round_up(hid, 8) * _round_up(c, 128)
             + _round_up(c, 8) * _round_up(hid, 128)) * 4
    small_pad = 8 * _round_up(c, 8) * 128 * 4       # scratch / gate buffers, padded

    if slab_bytes <= fused_slab_bytes:
        # ----- fused single-pass: read x once, write y once (2 HBM slabs) ----
        slab_pad_io = _round_up(c, 8) * _round_up(hw, 128) * itemsize
        slab_pad_f32 = _round_up(c, 8) * _round_up(hw, 128) * 4
        vmem = min(4 * slab_pad_io + 6 * slab_pad_f32 + 2 * w_pad + (4 << 20),
                   48 << 20)
        out = pl.pallas_call(
            functools.partial(_fused_kernel, hw=hw),
            out_shape=jax.ShapeDtypeStruct((n, c, hw), out_dtype),
            grid_spec=pltpu.PrefetchScalarGridSpec(
                num_scalar_prefetch=0,
                grid=(n,),
                in_specs=[pl.BlockSpec((1, c, hw), lambda b: (b, 0, 0)),
                          pl.BlockSpec((hid, c), lambda b: (0, 0)),
                          pl.BlockSpec((c, hid), lambda b: (0, 0))],
                out_specs=pl.BlockSpec((1, c, hw), lambda b: (b, 0, 0))),
            compiler_params=pltpu.CompilerParams(
                dimension_semantics=("parallel",),
                vmem_limit_bytes=int(vmem)),
        )(x3d, w1, w2)
        return out.reshape(n, c, h, w)

    # ----- two-pass: tiled reduction -> gate, then tiled gating pass ---------
    t1 = _pick_tile_hw(hw, c, itemsize, block_bytes_p1)   # pass 1 streams input only
    t2 = _pick_tile_hw(hw, c, itemsize, block_bytes_p2)   # pass 2 streams in + out
    n_t1 = pl.cdiv(hw, t1)
    n_t2 = pl.cdiv(hw, t2)

    blk1_pad = _round_up(c, 8) * _round_up(t1, 128) * itemsize
    blk2_pad = _round_up(c, 8) * _round_up(t2, 128) * itemsize

    gate = pl.pallas_call(
        functools.partial(_pool_gate_kernel, hw=hw, tile_hw=t1,
                          need_mask=(hw % t1 != 0)),
        out_shape=jax.ShapeDtypeStruct((n, c, 1), jnp.float32),
        grid_spec=pltpu.PrefetchScalarGridSpec(
            num_scalar_prefetch=0,
            grid=(n, n_t1),
            in_specs=[pl.BlockSpec((1, c, t1), lambda b, t: (b, 0, t)),
                      pl.BlockSpec((hid, c), lambda b, t: (0, 0)),
                      pl.BlockSpec((c, hid), lambda b, t: (0, 0))],
            out_specs=pl.BlockSpec((1, c, 1), lambda b, t: (b, 0, 0)),
            scratch_shapes=[pltpu.VMEM((c, 1), jnp.float32),    # running sum
                            pltpu.VMEM((c, 1), jnp.float32)]),  # running max
        compiler_params=pltpu.CompilerParams(
            dimension_semantics=("parallel", "arbitrary"),
            vmem_limit_bytes=int(2 * blk1_pad + 2 * w_pad + small_pad + (4 << 20))),
    )(x3d, w1, w2)

    out = pl.pallas_call(
        _apply_gate_kernel,
        out_shape=jax.ShapeDtypeStruct((n, c, hw), out_dtype),
        grid_spec=pltpu.PrefetchScalarGridSpec(
            num_scalar_prefetch=0,
            grid=(n, n_t2),
            in_specs=[pl.BlockSpec((1, c, t2), lambda b, t: (b, 0, t)),
                      pl.BlockSpec((1, c, 1), lambda b, t: (b, 0, 0))],
            out_specs=pl.BlockSpec((1, c, t2), lambda b, t: (b, 0, t))),
        compiler_params=pltpu.CompilerParams(
            dimension_semantics=("parallel", "parallel"),
            vmem_limit_bytes=int(4 * blk2_pad + small_pad + (4 << 20))),
    )(x3d, gate)

    return out.reshape(n, c, h, w)


# ---------------- pure-JAX reference (for correctness check only) ----------
def cbam_channel_reference(x_nchw, w1, w2):
    xf = x_nchw.astype(jnp.float32)
    avg = jnp.mean(xf, axis=(2, 3))                             # AdaptiveAvgPool2d(1)
    mx = jnp.max(xf, axis=(2, 3))                               # AdaptiveMaxPool2d(1)

    def mlp(v):  # torch Linear: y = v @ W.T
        return jnp.maximum(v @ w1.T, 0.0) @ w2.T

    gate = jax.nn.sigmoid(mlp(avg) + mlp(mx))
    return (xf * gate[:, :, None, None]).astype(x_nchw.dtype)


if __name__ == "__main__":
    key = jax.random.PRNGKey(0)
    k_x, k_w1, k_w2 = jax.random.split(key, 3)

    batch, channels, H, W = 2, 32, 16, 16
    reduction = 16
    hid = channels // reduction                                 # 2

    x = jax.random.normal(k_x, (batch, channels, H, W), jnp.float32)      # NCHW
    w1 = 0.1 * jax.random.normal(k_w1, (hid, channels), jnp.float32)      # fc1.weight
    w2 = 0.1 * jax.random.normal(k_w2, (channels, hid), jnp.float32)      # fc2.weight

    # 1) fused single-pass path (per-batch slab fits in VMEM).
    y = jax.jit(cbam_channel_forward)(x, w1, w2)
    jax.block_until_ready(y)
    y_ref = cbam_channel_reference(x, w1, w2)
    assert y.shape == x.shape
    assert jnp.allclose(y, y_ref, atol=1e-4, rtol=1e-4), \
        f"fused max abs err {float(jnp.max(jnp.abs(y - y_ref)))}"

    # 2) forced two-pass path: multi-tile with a lane-padded (masked) last tile.
    x2 = jax.random.normal(k_x, (2, channels, 12, 12), jnp.float32)       # hw = 144
    fwd_twopass = jax.jit(functools.partial(
        cbam_channel_forward, fused_slab_bytes=0,
        block_bytes_p1=channels * 128 * 4, block_bytes_p2=channels * 128 * 4))
    y2 = fwd_twopass(x2, w1, w2)
    jax.block_until_ready(y2)
    y2_ref = cbam_channel_reference(x2, w1, w2)
    assert jnp.allclose(y2, y2_ref, atol=1e-4, rtol=1e-4), \
        f"two-pass(masked) max abs err {float(jnp.max(jnp.abs(y2 - y2_ref)))}"

    # 3) forced two-pass path: multi-tile, exact lane multiple (no mask), N = 1.
    x3 = jax.random.normal(k_x, (1, channels, 16, 16), jnp.float32)       # hw = 256
    y3 = fwd_twopass(x3, w1, w2)
    jax.block_until_ready(y3)
    y3_ref = cbam_channel_reference(x3, w1, w2)
    assert jnp.allclose(y3, y3_ref, atol=1e-4, rtol=1e-4), \
        f"two-pass max abs err {float(jnp.max(jnp.abs(y3 - y3_ref)))}"

    print("KERNEL_OK")
</pallas_src>

<mosaic_0001>
module attributes {stable_mosaic.version = 11 : i64} {
  func.func @_fused_kernel(%arg0: i32, %arg1: memref<1x32x256xf32, #tpu.memory_space<vmem>>, %arg2: memref<2x32xf32, #tpu.memory_space<vmem>>, %arg3: memref<32x2xf32, #tpu.memory_space<vmem>>, %arg4: memref<1x32x256xf32, #tpu.memory_space<vmem>>) attributes {dimension_semantics = [#tpu.dimension_semantics<parallel>], iteration_bounds = array<i64: 2>, scalar_prefetch = 0 : i64, scratch_operands = 0 : i64, tpu.core_type = #tpu.core_type<tc>, window_params = [{transform_indices = @transform_0, window_bounds = array<i64: 1, 32, 256>}, {pipeline_mode = #tpu.pipeline_mode<synchronous>, transform_indices = @transform_1, window_bounds = array<i64: 2, 32>}, {pipeline_mode = #tpu.pipeline_mode<synchronous>, transform_indices = @transform_2, window_bounds = array<i64: 32, 2>}, {transform_indices = @transform_3, window_bounds = array<i64: 1, 32, 256>}]} {
    %c0 = arith.constant 0 : index
    %c0_0 = arith.constant 0 : index
    %c0_1 = arith.constant 0 : index
    %0 = vector.load %arg1[%c0, %c0_0, %c0_1] : memref<1x32x256xf32, #tpu.memory_space<vmem>>, vector<1x32x256xf32>
    %1 = vector.shape_cast %0 : vector<1x32x256xf32> to vector<32x256xf32>
    %cst = arith.constant dense<0.000000e+00> : vector<32xf32>
    %2 = vector.multi_reduction <add>, %1, %cst [1] : vector<32x256xf32> to vector<32xf32>
    %3 = vector.shape_cast %2 : vector<32xf32> to vector<32x1xf32>
    %cst_2 = arith.constant 3.906250e-03 : f32
    %4 = vector.broadcast %cst_2 : f32 to vector<32x1xf32>
    %5 = arith.mulf %3, %4 : vector<32x1xf32>
    %cst_3 = arith.constant dense<0xFF800000> : vector<32xf32>
    %6 = vector.multi_reduction <maximumf>, %1, %cst_3 [1] : vector<32x256xf32> to vector<32xf32>
    %7 = vector.shape_cast %6 : vector<32xf32> to vector<32x1xf32>
    %c0_4 = arith.constant 0 : index
    %c0_5 = arith.constant 0 : index
    %8 = vector.load %arg2[%c0_4, %c0_5] : memref<2x32xf32, #tpu.memory_space<vmem>>, vector<2x32xf32>
    %cst_6 = arith.constant dense<0.000000e+00> : vector<2x1xf32>
    %9 = tpu.matmul %8, %5, %cst_6 {dimension_numbers = #tpu.dot_dimension_numbers<[1], [0], [0], [1], [0, 0, 1, 1], [], []>} : vector<2x32xf32>, vector<32x1xf32>, vector<2x1xf32> -> vector<2x1xf32>
    %cst_7 = arith.constant 0.000000e+00 : f32
    %10 = vector.broadcast %cst_7 : f32 to vector<2x1xf32>
    %11 = arith.maximumf %9, %10 : vector<2x1xf32>
    %c0_8 = arith.constant 0 : index
    %c0_9 = arith.constant 0 : index
    %12 = vector.load %arg3[%c0_8, %c0_9] : memref<32x2xf32, #tpu.memory_space<vmem>>, vector<32x2xf32>
    %cst_10 = arith.constant dense<0.000000e+00> : vector<32x1xf32>
    %13 = tpu.matmul %12, %11, %cst_10 {dimension_numbers = #tpu.dot_dimension_numbers<[1], [0], [0], [1], [0, 0, 1, 1], [], []>} : vector<32x2xf32>, vector<2x1xf32>, vector<32x1xf32> -> vector<32x1xf32>
    %c0_11 = arith.constant 0 : index
    %c0_12 = arith.constant 0 : index
    %14 = vector.load %arg2[%c0_11, %c0_12] : memref<2x32xf32, #tpu.memory_space<vmem>>, vector<2x32xf32>
    %cst_13 = arith.constant dense<0.000000e+00> : vector<2x1xf32>
    %15 = tpu.matmul %14, %7, %cst_13 {dimension_numbers = #tpu.dot_dimension_numbers<[1], [0], [0], [1], [0, 0, 1, 1], [], []>} : vector<2x32xf32>, vector<32x1xf32>, vector<2x1xf32> -> vector<2x1xf32>
    %cst_14 = arith.constant 0.000000e+00 : f32
    %16 = vector.broadcast %cst_14 : f32 to vector<2x1xf32>
    %17 = arith.maximumf %15, %16 : vector<2x1xf32>
    %c0_15 = arith.constant 0 : index
    %c0_16 = arith.constant 0 : index
    %18 = vector.load %arg3[%c0_15, %c0_16] : memref<32x2xf32, #tpu.memory_space<vmem>>, vector<32x2xf32>
    %cst_17 = arith.constant dense<0.000000e+00> : vector<32x1xf32>
    %19 = tpu.matmul %18, %17, %cst_17 {dimension_numbers = #tpu.dot_dimension_numbers<[1], [0], [0], [1], [0, 0, 1, 1], [], []>} : vector<32x2xf32>, vector<2x1xf32>, vector<32x1xf32> -> vector<32x1xf32>
    %20 = arith.addf %13, %19 : vector<32x1xf32>
    %21 = arith.negf %20 : vector<32x1xf32>
    %22 = math.exp %21 : vector<32x1xf32>
    %cst_18 = arith.constant 1.000000e+00 : f32
    %23 = vector.broadcast %cst_18 : f32 to vector<32x1xf32>
    %24 = arith.addf %23, %22 : vector<32x1xf32>
    %25 = arith.divf %23, %24 : vector<32x1xf32>
    %26 = vector.broadcast %25 : vector<32x1xf32> to vector<32x256xf32>
    %27 = arith.mulf %1, %26 : vector<32x256xf32>
    %c0_19 = arith.constant 0 : index
    %c0_20 = arith.constant 0 : index
    %c0_21 = arith.constant 0 : index
    %28 = vector.load %arg4[%c0_19, %c0_20, %c0_21] : memref<1x32x256xf32, #tpu.memory_space<vmem>>, vector<1x32x256xf32>
    %29 = vector.shape_cast %28 : vector<1x32x256xf32> to vector<32x256xf32>
    %30 = vector.shape_cast %27 : vector<32x256xf32> to vector<1x32x256xf32>
    tpu.vector_store %arg4[%c0_19, %c0_20, %c0_21], %30 {strides = array<i32>} : memref<1x32x256xf32, #tpu.memory_space<vmem>>, vector<1x32x256xf32>,
    return
  }
  func.func @transform_0(%arg0: i32) -> (i32, i32, i32) {
    %c0_i32 = arith.constant 0 : i32
    %c0_i32_0 = arith.constant 0 : i32
    %c0_i32_1 = arith.constant 0 : i32
    return %arg0, %c0_i32, %c0_i32_0 : i32, i32, i32
  }
  func.func @transform_1(%arg0: i32) -> (i32, i32) {
    %c0_i32 = arith.constant 0 : i32
    %c0_i32_0 = arith.constant 0 : i32
    %c0_i32_1 = arith.constant 0 : i32
    return %c0_i32, %c0_i32_0 : i32, i32
  }
  func.func @transform_2(%arg0: i32) -> (i32, i32) {
    %c0_i32 = arith.constant 0 : i32
    %c0_i32_0 = arith.constant 0 : i32
    %c0_i32_1 = arith.constant 0 : i32
    return %c0_i32, %c0_i32_0 : i32, i32
  }
  func.func @transform_3(%arg0: i32) -> (i32, i32, i32) {
    %c0_i32 = arith.constant 0 : i32
    %c0_i32_0 = arith.constant 0 : i32
    %c0_i32_1 = arith.constant 0 : i32
    return %arg0, %c0_i32, %c0_i32_0 : i32, i32, i32
  }
}

</mosaic_0001>

<bundles_post_ra>
// kernel: cbam_channel_forward.1
= control target key start
LH: loop header
LB: loop body
LE: loop exit
PB: predicated region body
PF: predicated region fallthrough
CT: control target
= control target key end

     0   :  { %s828_s12 = smov 0   ;;  %s917_s0 = inlined_call_operand.vmem [shape: f32[2,32,256], index: 0, kind: input, shape index: {}]   ;;  %s918_s1 = inlined_call_operand.vmem [shape: f32[2,32], index: 1, kind: input, shape index: {}]   ;;  %s919_s2 = inlined_call_operand.vmem [shape: f32[32,2], index: 2, kind: input, shape index: {}]   ;;  %s920_s3 = inlined_call_operand.vmem [shape: f32[2,32,256], index: 3, kind: output, shape index: {}]  }
   0x1 LB: > { %s663_s13 = sadd.s32 4294967295, %s802_s12   ;;  %p667_p0 = scmp.ge.s32.totalorder %s802_s12, 1  ;;  %s802_s12 = sphi %s828_s12, %s13_s12  }
   0x2   : > { %p137_p1 = scmp.lt.s32.totalorder %s802_s12, 3 }
   0x4   : > { %p138_p2 = pnand %p667_p0, %p137_p1 }
   0x5   : > { %p161_p3 = scmp.lt.s32.totalorder (!%p138_p2), %s663_s13, 1  ;;  %v804_v16 = vmov (!%p138_p2), 0.0|0.0   ;;  %vm805_vm0 = vmmov (!%p138_p2), 0   ;;  %v806_v17 = vmov (!%p138_p2), 0.0   ;;  %v207_v31 = vld [vmem:[%s918_s1] sm:$0x3] (!%p138_p2) }
   0x6   : > { %141 = sbr.rel (%p138_p2) target bundleno = 787 (0x313), region = 32  ;;  %750 = vmatprep.subr.bf16.mxu1 (!%p138_p2), %v804_v16  ;;  %720 = vmatprep.mubr.msk.f32.mxu1 (!%p138_p2), %vm805_vm0, %v806_v17  ;;  %vm208_vm1 = vcmask (!%p138_p2), 261120   ;;  %v283_v35 = vld [vmem:[%s919_s2] sm:$0xff] (!%p138_p2)  ;;  %vm358_vm2 = vcmask (!%p138_p2), 15360   ;;  %vm371_vm3 = vcmask (!%p138_p2), 1041408   ;;  %v284_v41 = vld [vmem:[%s919_s2 + $0x8] sm:$0xff] (!%p138_p2) }
   0x7   : > { %736 = vmatprep.mubr.msk.f32.mxu0 (!%p138_p2), %vm358_vm2, %v283_v35  ;;  %v285_v43 = vld [vmem:[%s919_s2 + $0x10] sm:$0xff] (!%p138_p2)  ;;  %v286_v44 = vld [vmem:[%s919_s2 + $0x18] sm:$0xff] (!%p138_p2)  ;;  %v807_v45 = vmov (!%p138_p2), 0  }
   0x8   : > { %779 = vset.pattern.permute.xlu1 (!%p138_p2), %v807_v45  ;;  %778 = vset.pattern.permute.xlu0 (!%p138_p2), %v807_v45 }
   0xd   : > { %s922_s13 = smov (!%p161_p3, %s663_s13), 1 }
   0xe   : > { %s690_s14 = sshll.u32 %s922_s13, 6 }
   0xf   : > { %s165_s17 = scalar_lea.vmem %s917_s0, %s690_s14  ;;  %s170_s30 = scalar_lea.vmem %s920_s3, %s690_s14 }
  0x10   : > { %v844_v0 = vld [vmem:[%s165_s17 + $0x20] sm:$0xff]  ;;  %v846_v1 = vld [vmem:[%s165_s17 + $0x28] sm:$0xff]  ;;  %v854_v5 = vld [vmem:[%s165_s17 + $0x30] sm:$0xff] }
  0x11   : > { %v848_v2 = vld [vmem:[%s165_s17] sm:$0xff]  ;;  %v185_v3 = vadd.f32 %v846_v1, %v844_v0  ;;  %v852_v4 = vld [vmem:[%s165_s17 + $0x8] sm:$0xff]  ;;  %v856_v6 = vld [vmem:[%s165_s17 + $0x38] sm:$0xff]  ;;  %v201_v15 = vmax.f32 %v844_v0, %v846_v1 }
  0x12   : > { %v179_v7 = vadd.f32 %v852_v4, %v848_v2  ;;  %v860_v8 = vld [vmem:[%s165_s17 + $0x10] sm:$0xff]  ;;  %v862_v9 = vld [vmem:[%s165_s17 + $0x18] sm:$0xff]  ;;  %v188_v10 = vadd.f32 %v856_v6, %v854_v5  ;;  %v195_v13 = vmax.f32 %v848_v2, %v852_v4  ;;  %v204_v14 = vmax.f32 %v854_v5, %v856_v6 }
  0x13   : > { %186 = vadd.xlane.f32.xlu1 %v185_v3  ;;  %v182_v11 = vadd.f32 %v862_v9, %v860_v8  ;;  %v198_v12 = vmax.f32 %v860_v8, %v862_v9 }
  0x14   : > { %180 = vadd.xlane.f32.xlu0 %v179_v7 }
  0x17   : > { %189 = vadd.xlane.f32.xlu1 %v188_v10 }
  0x18   : > { %183 = vadd.xlane.f32.xlu0 %v182_v11 }
  0x1b   : > { %199 = vmax.xlane.f32.xlu1 %v198_v12 }
  0x1c   : > { %196 = vmax.xlane.f32.xlu0 %v195_v13 }
  0x1f   : > { %205 = vmax.xlane.f32.xlu1 %v204_v14 }
  0x20   : > { %202 = vmax.xlane.f32.xlu0 %v201_v15 }
  0xa0   : > { %v187_v18 = vpop.xlane.xlu1 %186 }
  0xa1   : > { %v181_v19 = vpop.xlane.xlu0 %180  ;;  %v193_v24 = vmul.f32 0.00390625, %v187_v18 }
  0xa2   : > { %v191_v22 = vmul.f32 0.00390625, %v181_v19 }
  0xa4   : > { %v190_v20 = vpop.xlane.xlu1 %189 }
  0xa5   : > { %v184_v21 = vpop.xlane.xlu0 %183  ;;  %v194_v25 = vmul.f32 0.00390625, %v190_v20 }
  0xa6   : > { %v192_v23 = vmul.f32 0.00390625, %v184_v21 }
  0xa7   : > { %v754_v29 = vpack.c.bf16 %v194_v25, %v193_v24 }
  0xa8   : > { %v751_v26 = vpack.c.bf16 %v192_v23, %v191_v22  ;;  %v200_v27 = vpop.xlane.xlu1 %199 }
  0xa9   : > { %v197_v28 = vpop.xlane.xlu0 %196 }
  0xaa   : > { %752 = vmatpush3.bf16.msra.mxu1 %v751_v26  ;;  %v757_v30 = vpack.c.bf16 %v200_v27, %v197_v28 }
  0xab   : > { %753 = vmatprep.subr.bf16.mxu1 %v804_v16 }
  0xac   : > { %v206_v32 = vpop.xlane.xlu1 %205 }
  0xad   : > { %v203_v33 = vpop.xlane.xlu0 %202 }
  0xae   : > { %755 = vmatpush3.bf16.msra.mxu1 %v754_v29  ;;  %v760_v34 = vpack.c.bf16 %v206_v32, %v203_v33 }
  0xaf   : > { %756 = vmatprep.subr.bf16.mxu1 %v804_v16 }
  0xb1   : > { %721 = vmatmul.mubr.msk.f32.vlgmr.msra.gmra.mrb[0].mxu1 %vm208_vm1, %v207_v31 }
  0xb2   : > { %758 = vmatpush3.bf16.msra.mxu1 %v757_v30  ;;  %731 = vmatprep.mubr.msk.f32.mxu1 %vm805_vm0, %v806_v17 }
  0xb3   : > { %759 = vmatprep.subr.bf16.mxu1 %v804_v16 }
  0xb6   : > { %761 = vmatpush3.bf16.msra.mxu1 %v760_v34 }
  0xb9   : > { %732 = vmatmul.mubr.msk.f32.vlgmr.msra.gmra.mrb[2].mxu1 %vm208_vm1, %v207_v31 }
 0x184   : > { %v278_v36 = vpop.f32.mrb[0].mxu1 }
 0x185   : > { %v722_v37 = vpop.f32.mrb[1].mxu1  ;;  %v282_v42 = vmax.f32 %v278_v36, 0.0 }
 0x18c   : > { %v353_v38 = vpop.f32.mrb[2].mxu1 }
 0x18d   : > { %v357_v39 = vmax.f32 %v353_v38, 0.0  ;;  %v733_v40 = vpop.f32.mrb[3].mxu1 }
 0x18f   : > { %734 = vmatprep.subr.msk.mxu0 %vm371_vm3, %v357_v39 }
 0x190   : > { %735 = vmatpush3.msk.msra.mxu0 %vm371_vm3, %v357_v39 }
 0x191   : > { %737 = vmatmul.mubr.msk.f32.vlgmr.msra.gmra.mrb[0].mxu0 %vm358_vm2, %v284_v41  ;;  %742 = vmatprep.subr.msk.mxu0 %vm371_vm3, %v282_v42 }
 0x192   : > { %743 = vmatpush3.msk.msra.mxu0 %vm371_vm3, %v282_v42  ;;  %739 = vmatprep.mubr.msk.f32.mxu0 %vm358_vm2, %v285_v43 }
 0x195   : > { %740 = vmatmul.mubr.msk.f32.gmra.mrb[2].mxu0 %vm358_vm2, %v286_v44 }
 0x196   : > { %744 = vmatprep.mubr.msk.f32.mxu0 %vm358_vm2, %v283_v35 }
 0x199   : > { %745 = vmatmul.mubr.msk.f32.vlgmr.msra.gmra.mrb[0].mxu0 %vm358_vm2, %v284_v41 }
 0x19a   : > { %747 = vmatprep.mubr.msk.f32.mxu0 %vm358_vm2, %v285_v43 }
 0x19d   : > { %748 = vmatmul.mubr.msk.f32.gmra.mrb[2].mxu0 %vm358_vm2, %v286_v44 }
 0x26c   : > { %v746_v46 = vpop.f32.mrb[0].mxu0 }
 0x26d   : > { %v685_v47 = vmul.f32 -1.442695, %v746_v46  ;;  %v529_v48 = vpop.f32.mrb[1].mxu0 }
 0x26e   : > { %v684_v49 = vmul.f32 -1.442695, %v529_v48 }
 0x26f   : > { %780 = vpow2.f32 %v685_v47 }
 0x270   : > { %782 = vpow2.f32 %v684_v49  ;;  %v749_v50 = vpop.f32.mrb[2].mxu0 }
 0x271   : > { %v687_v51 = vmul.f32 -1.442695, %v749_v50  ;;  %v539_v52 = vpop.f32.mrb[3].mxu0 }
 0x272   : > { %v686_v53 = vmul.f32 -1.442695, %v539_v52 }
 0x273   : > { %784 = vpow2.f32 %v687_v51 }
 0x274   : > { %786 = vpow2.f32 %v686_v53 }
 0x279   : > { %v781_v54 = vpop.eup %780 }
 0x27a   : > { %v783_v55 = vpop.eup %782  ;;  %v561_v56 = vadd.f32 1.0, %v781_v54 }
 0x27b   : > { %v560_v57 = vadd.f32 1.0, %v783_v55 }
 0x27c   : > { %788 = vrcp.f32 %v561_v56 }
 0x27d   : > { %v785_v58 = vpop.eup %784  ;;  %790 = vrcp.f32 %v560_v57 }
 0x27e   : > { %v787_v59 = vpop.eup %786  ;;  %v563_v61 = vadd.f32 1.0, %v785_v58 }
 0x27f   : > { %v562_v60 = vadd.f32 1.0, %v787_v59 }
 0x281   : > { %792 = vrcp.f32 %v562_v60 }
 0x282   : > { %794 = vrcp.f32 %v563_v61 }
 0x286   : > { %v789_v62 = vpop.eup %788 }
 0x287   : > { %v791_v63 = vpop.eup %790  ;;  %579 = vperm.xlu1 %779, %v789_v62  }
 0x288   : > { %574 = vperm.xlu0 %778, %v791_v63  }
 0x28b   : > { %v793_v3 = vpop.eup %792 }
 0x28c   : > { %584 = vperm.xlu1 %779, %v793_v3   ;;  %v795_v7 = vpop.eup %794 }
 0x290   : > { %589 = vperm.xlu1 %779, %v795_v7  }
 0x306   : > { %v580_v10 = vpop.permute.xlu1 %579 }
 0x307   : > { %v594_v11 = vmul.f32 %v580_v10, %v860_v8  ;;  %v595_v12 = vmul.f32 %v580_v10, %v862_v9  ;;  %v575_v13 = vpop.permute.xlu0 %574 }
 0x308   : > { %v592_v14 = vmul.f32 %v575_v13, %v848_v2  ;;  %v593_v15 = vmul.f32 %v575_v13, %v852_v4 }
 0x309   : > { %602 = vst [vmem:[%s170_s30 + $0x10] sm:$0xff] %v594_v11  ;;  %603 = vst [vmem:[%s170_s30 + $0x18] sm:$0xff] %v595_v12 }
 0x30a   : > { %600 = vst [vmem:[%s170_s30] sm:$0xff] %v592_v14  ;;  %601 = vst [vmem:[%s170_s30 + $0x8] sm:$0xff] %v593_v15 }
 0x30b   : > { %v585_v16 = vpop.permute.xlu1 %584 }
 0x30c   : > { %v596_v17 = vmul.f32 %v585_v16, %v844_v0  ;;  %v597_v18 = vmul.f32 %v585_v16, %v846_v1 }
 0x30e   : > { %604 = vst [vmem:[%s170_s30 + $0x20] sm:$0xff] %v596_v17  ;;  %605 = vst [vmem:[%s170_s30 + $0x28] sm:$0xff] %v597_v18 }
 0x30f   : > { %v590_v19 = vpop.permute.xlu1 %589 }
 0x310   : > { %v598_v8 = vmul.f32 %v590_v19, %v854_v5  ;;  %v599_v9 = vmul.f32 %v590_v19, %v856_v6 }
 0x312   : > { %606 = vst [vmem:[%s170_s30 + $0x30] sm:$0xff] %v598_v8  ;;  %607 = vst [vmem:[%s170_s30 + $0x38] sm:$0xff] %v599_v9 }
 0x313 PF: > { %s13_s12 = sadd.s32 1, %s802_s12  }
 0x314   : > { %p10_p4 = scmp.ge.s32.totalorder %s13_s12, 4  }
 0x316   :  { %12 = sbr.rel (!%p10_p4) target bundleno = 1 (0x1), region = 62 }

</bundles_post_ra>
